<compile_context>
chip_gen: v5e
topology: v5e:2x2
jax: 0.10.0
libtpu: 0.0.40
codegen_flags: <defaults>
</compile_context>

<pallas_src>
import functools
import numpy as np
import jax
import jax.numpy as jnp
from jax.experimental import pallas as pl
from jax.experimental.pallas import tpu as pltpu


def _pick_tile(n, cap=256):
    """Largest power-of-two tile <= cap that divides n (else the full dim)."""
    for t in (256, 128, 64, 32, 16, 8):
        if t <= cap and n % t == 0:
            return t
    return n


# ----------------------------------------------------------------------------
# Kernel A: fused Q/K/V projection + RoPE.  Grid (B, S-tiles, H).
# ----------------------------------------------------------------------------
def qkv_rope_kernel(x_ref, wq_ref, wk_ref, wv_ref, cos_ref, sin_ref,
                    q_ref, k_ref, v_ref, *, scale):
    x = x_ref[0]                                           # (ts, D) bf16

    q = jnp.dot(x, wq_ref[0], preferred_element_type=jnp.float32)  # (ts, d_k)
    k = jnp.dot(x, wk_ref[0], preferred_element_type=jnp.float32)
    v = jnp.dot(x, wv_ref[0], preferred_element_type=jnp.float32)

    c = cos_ref[...]                                       # (ts, d_k//2) f32
    s = sin_ref[...]
    half = c.shape[-1]

    # RoPE in rotate-half layout (Wq/Wk columns permuted offline so each head
    # is [even dims | odd dims]).  Pure VPU work: no MXU matmul, all f32.
    qe, qo = q[:, :half], q[:, half:]
    ke, ko = k[:, :half], k[:, half:]
    q = jnp.concatenate([qe * c - qo * s, qo * c + qe * s], axis=-1) * scale
    k = jnp.concatenate([ke * c - ko * s, ko * c + ke * s], axis=-1)

    q_ref[0, 0] = q.astype(q_ref.dtype)                    # bf16 intermediates
    k_ref[0, 0] = k.astype(k_ref.dtype)
    v_ref[0, 0] = v.astype(v_ref.dtype)


# ----------------------------------------------------------------------------
# Kernel B: flash attention + fused output projection.
# Grid (B, q-tiles, H, kv-tiles); (parallel, parallel, arbitrary, arbitrary).
# ----------------------------------------------------------------------------
def flash_attn_kernel(q_ref, k_ref, v_ref, wo_ref, o_ref,
                      m_ref, l_ref, acc_ref, *, tq, tk):
    qi = pl.program_id(1)
    h = pl.program_id(2)
    ki = pl.program_id(3)
    n_kv = pl.num_programs(3)

    # Zero the resident (tq, D) output block once per (batch, q-tile).
    @pl.when((h == 0) & (ki == 0))
    def _zero_out():
        o_ref[...] = jnp.zeros_like(o_ref)

    # Reset the online-softmax state at the start of every head's kv sweep.
    @pl.when(ki == 0)
    def _reset_state():
        m_ref[...] = jnp.full_like(m_ref, -1e30)
        l_ref[...] = jnp.zeros_like(l_ref)
        acc_ref[...] = jnp.zeros_like(acc_ref)

    # Causal tile skip: skip kv tiles that lie entirely in the future.
    @pl.when(ki * tk <= qi * tq + (tq - 1))
    def _update():
        q = q_ref[0, 0]                                    # (tq, d_k) bf16
        k = k_ref[0, 0]                                    # (tk, d_k) bf16
        # NT contraction on the last dims: no materialized k.T.
        s = jax.lax.dot_general(q, k, (((1,), (1,)), ((), ())),
                                preferred_element_type=jnp.float32)  # (tq, tk)
        # Causal mask computed in-kernel (no HBM bias input).
        q_pos = qi * tq + jax.lax.broadcasted_iota(jnp.int32, (tq, tk), 0)
        k_pos = ki * tk + jax.lax.broadcasted_iota(jnp.int32, (tq, tk), 1)
        mask = k_pos <= q_pos
        s = jnp.where(mask, s, -1e30)

        m_prev = m_ref[...]
        m_new = jnp.maximum(m_prev, jnp.max(s, axis=-1, keepdims=True))
        alpha = jnp.exp(m_prev - m_new)
        p = jnp.where(mask, jnp.exp(s - m_new), 0.0)
        l_ref[...] = alpha * l_ref[...] + jnp.sum(p, axis=-1, keepdims=True)
        acc_ref[...] = alpha * acc_ref[...] + jnp.dot(
            p.astype(jnp.bfloat16), v_ref[0, 0],
            preferred_element_type=jnp.float32)
        m_ref[...] = m_new

    # After the last kv tile: normalize and fold this head's contribution into
    # the fused output projection (lane-dense (tq, D) accumulation).
    @pl.when(ki == n_kv - 1)
    def _finalize():
        ctx = acc_ref[...] * pl.reciprocal(l_ref[...], approx=True)
        contrib = jnp.dot(ctx.astype(jnp.bfloat16), wo_ref[0],
                          preferred_element_type=jnp.float32)   # (tq, D)
        o_ref[0] = o_ref[0] + contrib


# ----------------------------------------------------------------------------
# Wrapper
# ----------------------------------------------------------------------------
def multi_head_self_attention(x, p_q, p_k, p_v, p_o, *, num_heads,
                              theta=10000.0):
    """x: (B, S, D) f32.  p_q/p_k/p_v: (H*d_k, D).  p_o: (D, H*d_k)."""
    B, S, D = x.shape
    assert D % num_heads == 0
    d_k = D // num_heads
    assert d_k % 2 == 0, "RoPE requires an even head dimension"
    half = d_k // 2
    scale = 1.0 / float(np.sqrt(d_k))

    ts = _pick_tile(S)
    tq = _pick_tile(S)
    tk = _pick_tile(S)

    # ---- one-time parameter / table prep (outside the kernels) ----
    # Rotate-half column permutation: per head, even dims first then odd dims.
    head_perm = np.concatenate([np.arange(0, d_k, 2), np.arange(1, d_k, 2)])
    perm = np.concatenate([head_perm + h * d_k for h in range(num_heads)])

    wq = (p_q.T[:, perm].reshape(D, num_heads, d_k)
          .transpose(1, 0, 2).astype(jnp.bfloat16))        # (H, D, d_k)
    wk = (p_k.T[:, perm].reshape(D, num_heads, d_k)
          .transpose(1, 0, 2).astype(jnp.bfloat16))
    wv = (p_v.T.reshape(D, num_heads, d_k)
          .transpose(1, 0, 2).astype(jnp.bfloat16))        # (H, D, d_k)
    wo = p_o.T.reshape(num_heads, d_k, D).astype(jnp.bfloat16)  # (H, d_k, D)

    # RoPE tables: (S, d_k//2) f32 (token_positions = arange(S)).
    pos = jnp.arange(S, dtype=jnp.float32)
    inv_freq = theta ** (-jnp.arange(0, d_k, 2, dtype=jnp.float32) / d_k)
    ang = pos[:, None] * inv_freq[None, :]                 # (S, d_k//2)
    cos_t = jnp.cos(ang)
    sin_t = jnp.sin(ang)

    x_in = x.astype(jnp.bfloat16)

    # Kernel A: Q/K/V projection + RoPE -> bf16 (B, H, S, d_k).
    q, k, v = pl.pallas_call(
        functools.partial(qkv_rope_kernel, scale=scale),
        out_shape=[jax.ShapeDtypeStruct((B, num_heads, S, d_k), jnp.bfloat16)] * 3,
        grid_spec=pltpu.PrefetchScalarGridSpec(
            num_scalar_prefetch=0,
            grid=(B, S // ts, num_heads),
            in_specs=[
                pl.BlockSpec((1, ts, D), lambda b, si, h: (b, si, 0)),     # x
                pl.BlockSpec((1, D, d_k), lambda b, si, h: (h, 0, 0)),     # Wq
                pl.BlockSpec((1, D, d_k), lambda b, si, h: (h, 0, 0)),     # Wk
                pl.BlockSpec((1, D, d_k), lambda b, si, h: (h, 0, 0)),     # Wv
                pl.BlockSpec((ts, half), lambda b, si, h: (si, 0)),        # cos
                pl.BlockSpec((ts, half), lambda b, si, h: (si, 0)),        # sin
            ],
            out_specs=[
                pl.BlockSpec((1, 1, ts, d_k), lambda b, si, h: (b, h, si, 0)),
                pl.BlockSpec((1, 1, ts, d_k), lambda b, si, h: (b, h, si, 0)),
                pl.BlockSpec((1, 1, ts, d_k), lambda b, si, h: (b, h, si, 0)),
            ],
        ),
        compiler_params=pltpu.CompilerParams(
            dimension_semantics=("parallel", "parallel", "arbitrary"),
            vmem_limit_bytes=64 * 1024 * 1024,
        ),
    )(x_in, wq, wk, wv, cos_t, sin_t)

    # Kernel B: flash attention + fused output projection -> f32 (B, S, D).
    out = pl.pallas_call(
        functools.partial(flash_attn_kernel, tq=tq, tk=tk),
        out_shape=jax.ShapeDtypeStruct((B, S, D), jnp.float32),
        grid_spec=pltpu.PrefetchScalarGridSpec(
            num_scalar_prefetch=0,
            grid=(B, S // tq, num_heads, S // tk),
            in_specs=[
                pl.BlockSpec((1, 1, tq, d_k), lambda b, qi, h, ki: (b, h, qi, 0)),
                pl.BlockSpec((1, 1, tk, d_k), lambda b, qi, h, ki: (b, h, ki, 0)),
                pl.BlockSpec((1, 1, tk, d_k), lambda b, qi, h, ki: (b, h, ki, 0)),
                pl.BlockSpec((1, d_k, D), lambda b, qi, h, ki: (h, 0, 0)),
            ],
            out_specs=pl.BlockSpec((1, tq, D), lambda b, qi, h, ki: (b, qi, 0)),
            scratch_shapes=[
                pltpu.VMEM((tq, 1), jnp.float32),      # running max m
                pltpu.VMEM((tq, 1), jnp.float32),      # running denom l
                pltpu.VMEM((tq, d_k), jnp.float32),    # flash accumulator
            ],
        ),
        compiler_params=pltpu.CompilerParams(
            dimension_semantics=("parallel", "parallel", "arbitrary", "arbitrary"),
            vmem_limit_bytes=64 * 1024 * 1024,
        ),
    )(q, k, v, wo)
    return out


# ----------------------------------------------------------------------------
# Pure-JAX f32 reference mirroring the PyTorch forward.
# ----------------------------------------------------------------------------
def reference(x, p_q, p_k, p_v, p_o, *, num_heads, theta=10000.0):
    B, S, D = x.shape
    d_k = D // num_heads

    def split_heads(t):
        return t.reshape(B, S, num_heads, d_k).transpose(0, 2, 1, 3)

    q = split_heads(jnp.einsum('bsd,ed->bse', x, p_q))
    k = split_heads(jnp.einsum('bsd,ed->bse', x, p_k))
    v = split_heads(jnp.einsum('bsd,ed->bse', x, p_v))

    pos = jnp.arange(S, dtype=jnp.float32)
    inv_freq = theta ** (-jnp.arange(0, d_k, 2, dtype=jnp.float32) / d_k)
    ang = pos[:, None] * inv_freq[None, :]
    cos = jnp.repeat(jnp.cos(ang), 2, axis=-1)
    sin = jnp.repeat(jnp.sin(ang), 2, axis=-1)

    def rope(t):
        t_even = t[..., 0::2]
        t_odd = t[..., 1::2]
        swapped = jnp.stack([-t_odd, t_even], axis=-1).reshape(t.shape)
        return t * cos + swapped * sin

    q = rope(q)
    k = rope(k)

    s = jnp.einsum('bhqd,bhkd->bhqk', q, k) / jnp.sqrt(jnp.float32(d_k))
    mask = jnp.tril(jnp.ones((S, S), bool))
    s = jnp.where(mask, s, -jnp.inf)
    a = jax.nn.softmax(s, axis=-1)
    o = jnp.einsum('bhqk,bhkd->bhqd', a, v)
    o = o.transpose(0, 2, 1, 3).reshape(B, S, D)
    return o @ p_o.T


if __name__ == "__main__":
    # Small shapes consistent with the module.
    B, S, d_model, num_heads = 2, 8, 32, 4
    theta = 10000.0
    d_k = d_model // num_heads

    key = jax.random.PRNGKey(0)
    k_x, k_q, k_k, k_v, k_o = jax.random.split(key, 5)

    def trunc_init(k, shape, std):
        # matches nn.init.trunc_normal_(mean=0, std=std, a=-3*std, b=3*std)
        return std * jax.random.truncated_normal(k, -3.0, 3.0, shape, jnp.float32)

    std_qk = 2.0 / (num_heads * d_k + d_model)
    std_vo = 2.0 / (num_heads * d_k + d_model)
    P_Q = trunc_init(k_q, (num_heads * d_k, d_model), std_qk)
    P_K = trunc_init(k_k, (num_heads * d_k, d_model), std_qk)
    P_V = trunc_init(k_v, (num_heads * d_k, d_model), std_vo)
    P_O = trunc_init(k_o, (d_model, num_heads * d_k), std_vo)

    x = jax.random.normal(k_x, (B, S, d_model), jnp.float32)

    out = multi_head_self_attention(x, P_Q, P_K, P_V, P_O,
                                    num_heads=num_heads, theta=theta)
    out = jax.block_until_ready(out)

    ref = reference(x, P_Q, P_K, P_V, P_O, num_heads=num_heads, theta=theta)
    assert out.shape == (B, S, d_model)
    max_err = float(np.max(np.abs(np.asarray(out) - np.asarray(ref))))
    # bf16 MXU operands -> compare with a bf16-appropriate tolerance.
    assert np.allclose(np.asarray(out), np.asarray(ref),
                       atol=2e-2, rtol=2e-2), f"max abs err = {max_err}"

    print("KERNEL_OK")
</pallas_src>

<mosaic_0001>
module attributes {stable_mosaic.version = 11 : i64} {
  func.func @qkv_rope_kernel(%arg0: i32, %arg1: i32, %arg2: i32, %arg3: memref<1x8x32xbf16, #tpu.memory_space<vmem>>, %arg4: memref<1x32x8xbf16, #tpu.memory_space<vmem>>, %arg5: memref<1x32x8xbf16, #tpu.memory_space<vmem>>, %arg6: memref<1x32x8xbf16, #tpu.memory_space<vmem>>, %arg7: memref<8x4xf32, #tpu.memory_space<vmem>>, %arg8: memref<8x4xf32, #tpu.memory_space<vmem>>, %arg9: memref<1x1x8x8xbf16, #tpu.memory_space<vmem>>, %arg10: memref<1x1x8x8xbf16, #tpu.memory_space<vmem>>, %arg11: memref<1x1x8x8xbf16, #tpu.memory_space<vmem>>) attributes {dimension_semantics = [#tpu.dimension_semantics<parallel>, #tpu.dimension_semantics<parallel>, #tpu.dimension_semantics<arbitrary>], iteration_bounds = array<i64: 2, 1, 4>, scalar_prefetch = 0 : i64, scratch_operands = 0 : i64, tpu.core_type = #tpu.core_type<tc>, window_params = [{transform_indices = @transform_0, window_bounds = array<i64: 1, 8, 32>}, {transform_indices = @transform_1, window_bounds = array<i64: 1, 32, 8>}, {transform_indices = @transform_2, window_bounds = array<i64: 1, 32, 8>}, {transform_indices = @transform_3, window_bounds = array<i64: 1, 32, 8>}, {transform_indices = @transform_4, window_bounds = array<i64: 8, 4>}, {transform_indices = @transform_5, window_bounds = array<i64: 8, 4>}, {transform_indices = @transform_6, window_bounds = array<i64: 1, 1, 8, 8>}, {transform_indices = @transform_7, window_bounds = array<i64: 1, 1, 8, 8>}, {transform_indices = @transform_8, window_bounds = array<i64: 1, 1, 8, 8>}]} {
    %c0 = arith.constant 0 : index
    %c0_0 = arith.constant 0 : index
    %c0_1 = arith.constant 0 : index
    %0 = vector.load %arg3[%c0, %c0_0, %c0_1] : memref<1x8x32xbf16, #tpu.memory_space<vmem>>, vector<1x8x32xbf16>
    %1 = vector.shape_cast %0 : vector<1x8x32xbf16> to vector<8x32xbf16>
    %c0_2 = arith.constant 0 : index
    %c0_3 = arith.constant 0 : index
    %c0_4 = arith.constant 0 : index
    %2 = vector.load %arg4[%c0_2, %c0_3, %c0_4] : memref<1x32x8xbf16, #tpu.memory_space<vmem>>, vector<1x32x8xbf16>
    %3 = vector.shape_cast %2 : vector<1x32x8xbf16> to vector<32x8xbf16>
    %cst = arith.constant dense<0.000000e+00> : vector<8x8xf32>
    %4 = tpu.matmul %1, %3, %cst {dimension_numbers = #tpu.dot_dimension_numbers<[1], [0], [0], [1], [0, 0, 1, 1], [], []>} : vector<8x32xbf16>, vector<32x8xbf16>, vector<8x8xf32> -> vector<8x8xf32>
    %c0_5 = arith.constant 0 : index
    %c0_6 = arith.constant 0 : index
    %c0_7 = arith.constant 0 : index
    %5 = vector.load %arg5[%c0_5, %c0_6, %c0_7] : memref<1x32x8xbf16, #tpu.memory_space<vmem>>, vector<1x32x8xbf16>
    %6 = vector.shape_cast %5 : vector<1x32x8xbf16> to vector<32x8xbf16>
    %cst_8 = arith.constant dense<0.000000e+00> : vector<8x8xf32>
    %7 = tpu.matmul %1, %6, %cst_8 {dimension_numbers = #tpu.dot_dimension_numbers<[1], [0], [0], [1], [0, 0, 1, 1], [], []>} : vector<8x32xbf16>, vector<32x8xbf16>, vector<8x8xf32> -> vector<8x8xf32>
    %c0_9 = arith.constant 0 : index
    %c0_10 = arith.constant 0 : index
    %c0_11 = arith.constant 0 : index
    %8 = vector.load %arg6[%c0_9, %c0_10, %c0_11] : memref<1x32x8xbf16, #tpu.memory_space<vmem>>, vector<1x32x8xbf16>
    %9 = vector.shape_cast %8 : vector<1x32x8xbf16> to vector<32x8xbf16>
    %cst_12 = arith.constant dense<0.000000e+00> : vector<8x8xf32>
    %10 = tpu.matmul %1, %9, %cst_12 {dimension_numbers = #tpu.dot_dimension_numbers<[1], [0], [0], [1], [0, 0, 1, 1], [], []>} : vector<8x32xbf16>, vector<32x8xbf16>, vector<8x8xf32> -> vector<8x8xf32>
    %c0_13 = arith.constant 0 : index
    %c0_14 = arith.constant 0 : index
    %11 = vector.load %arg7[%c0_13, %c0_14] : memref<8x4xf32, #tpu.memory_space<vmem>>, vector<8x4xf32>
    %c0_15 = arith.constant 0 : index
    %c0_16 = arith.constant 0 : index
    %12 = vector.load %arg8[%c0_15, %c0_16] : memref<8x4xf32, #tpu.memory_space<vmem>>, vector<8x4xf32>
    %13 = vector.extract_strided_slice %4 {offsets = [0, 0], sizes = [8, 4], strides = [1, 1]} : vector<8x8xf32> to vector<8x4xf32>
    %14 = vector.extract_strided_slice %4 {offsets = [0, 4], sizes = [8, 4], strides = [1, 1]} : vector<8x8xf32> to vector<8x4xf32>
    %15 = vector.extract_strided_slice %7 {offsets = [0, 0], sizes = [8, 4], strides = [1, 1]} : vector<8x8xf32> to vector<8x4xf32>
    %16 = vector.extract_strided_slice %7 {offsets = [0, 4], sizes = [8, 4], strides = [1, 1]} : vector<8x8xf32> to vector<8x4xf32>
    %17 = arith.mulf %13, %11 : vector<8x4xf32>
    %18 = arith.mulf %14, %12 : vector<8x4xf32>
    %19 = arith.subf %17, %18 : vector<8x4xf32>
    %20 = arith.mulf %14, %11 : vector<8x4xf32>
    %21 = arith.mulf %13, %12 : vector<8x4xf32>
    %22 = arith.addf %20, %21 : vector<8x4xf32>
    %23 = tpu.concatenate %19, %22 in 1 : vector<8x4xf32>, vector<8x4xf32> -> vector<8x8xf32>
    %cst_17 = arith.constant 0.353553385 : f32
    %24 = vector.broadcast %cst_17 : f32 to vector<8x8xf32>
    %25 = arith.mulf %23, %24 : vector<8x8xf32>
    %26 = arith.mulf %15, %11 : vector<8x4xf32>
    %27 = arith.mulf %16, %12 : vector<8x4xf32>
    %28 = arith.subf %26, %27 : vector<8x4xf32>
    %29 = arith.mulf %16, %11 : vector<8x4xf32>
    %30 = arith.mulf %15, %12 : vector<8x4xf32>
    %31 = arith.addf %29, %30 : vector<8x4xf32>
    %32 = tpu.concatenate %28, %31 in 1 : vector<8x4xf32>, vector<8x4xf32> -> vector<8x8xf32>
    %33 = arith.truncf %25 : vector<8x8xf32> to vector<8x8xbf16>
    %c0_18 = arith.constant 0 : index
    %c0_19 = arith.constant 0 : index
    %c0_20 = arith.constant 0 : index
    %c0_21 = arith.constant 0 : index
    %34 = vector.load %arg9[%c0_18, %c0_19, %c0_20, %c0_21] : memref<1x1x8x8xbf16, #tpu.memory_space<vmem>>, vector<1x1x8x8xbf16>
    %35 = vector.shape_cast %34 : vector<1x1x8x8xbf16> to vector<8x8xbf16>
    %36 = vector.shape_cast %33 : vector<8x8xbf16> to vector<1x1x8x8xbf16>
    tpu.vector_store %arg9[%c0_18, %c0_19, %c0_20, %c0_21], %36 {strides = array<i32>} : memref<1x1x8x8xbf16, #tpu.memory_space<vmem>>, vector<1x1x8x8xbf16>,
    %37 = arith.truncf %32 : vector<8x8xf32> to vector<8x8xbf16>
    %c0_22 = arith.constant 0 : index
    %c0_23 = arith.constant 0 : index
    %c0_24 = arith.constant 0 : index
    %c0_25 = arith.constant 0 : index
    %38 = vector.load %arg10[%c0_22, %c0_23, %c0_24, %c0_25] : memref<1x1x8x8xbf16, #tpu.memory_space<vmem>>, vector<1x1x8x8xbf16>
    %39 = vector.shape_cast %38 : vector<1x1x8x8xbf16> to vector<8x8xbf16>
    %40 = vector.shape_cast %37 : vector<8x8xbf16> to vector<1x1x8x8xbf16>
    tpu.vector_store %arg10[%c0_22, %c0_23, %c0_24, %c0_25], %40 {strides = array<i32>} : memref<1x1x8x8xbf16, #tpu.memory_space<vmem>>, vector<1x1x8x8xbf16>,
    %41 = arith.truncf %10 : vector<8x8xf32> to vector<8x8xbf16>
    %c0_26 = arith.constant 0 : index
    %c0_27 = arith.constant 0 : index
    %c0_28 = arith.constant 0 : index
    %c0_29 = arith.constant 0 : index
    %42 = vector.load %arg11[%c0_26, %c0_27, %c0_28, %c0_29] : memref<1x1x8x8xbf16, #tpu.memory_space<vmem>>, vector<1x1x8x8xbf16>
    %43 = vector.shape_cast %42 : vector<1x1x8x8xbf16> to vector<8x8xbf16>
    %44 = vector.shape_cast %41 : vector<8x8xbf16> to vector<1x1x8x8xbf16>
    tpu.vector_store %arg11[%c0_26, %c0_27, %c0_28, %c0_29], %44 {strides = array<i32>} : memref<1x1x8x8xbf16, #tpu.memory_space<vmem>>, vector<1x1x8x8xbf16>,
    return
  }
  func.func @transform_0(%arg0: i32, %arg1: i32, %arg2: i32) -> (i32, i32, i32) {
    %c0_i32 = arith.constant 0 : i32
    %c0_i32_0 = arith.constant 0 : i32
    return %arg0, %arg1, %c0_i32 : i32, i32, i32
  }
  func.func @transform_1(%arg0: i32, %arg1: i32, %arg2: i32) -> (i32, i32, i32) {
    %c0_i32 = arith.constant 0 : i32
    %c0_i32_0 = arith.constant 0 : i32
    %c0_i32_1 = arith.constant 0 : i32
    return %arg2, %c0_i32, %c0_i32_0 : i32, i32, i32
  }
  func.func @transform_2(%arg0: i32, %arg1: i32, %arg2: i32) -> (i32, i32, i32) {
    %c0_i32 = arith.constant 0 : i32
    %c0_i32_0 = arith.constant 0 : i32
    %c0_i32_1 = arith.constant 0 : i32
    return %arg2, %c0_i32, %c0_i32_0 : i32, i32, i32
  }
  func.func @transform_3(%arg0: i32, %arg1: i32, %arg2: i32) -> (i32, i32, i32) {
    %c0_i32 = arith.constant 0 : i32
    %c0_i32_0 = arith.constant 0 : i32
    %c0_i32_1 = arith.constant 0 : i32
    return %arg2, %c0_i32, %c0_i32_0 : i32, i32, i32
  }
  func.func @transform_4(%arg0: i32, %arg1: i32, %arg2: i32) -> (i32, i32) {
    %c0_i32 = arith.constant 0 : i32
    %c0_i32_0 = arith.constant 0 : i32
    return %arg1, %c0_i32 : i32, i32
  }
  func.func @transform_5(%arg0: i32, %arg1: i32, %arg2: i32) -> (i32, i32) {
    %c0_i32 = arith.constant 0 : i32
    %c0_i32_0 = arith.constant 0 : i32
    return %arg1, %c0_i32 : i32, i32
  }
  func.func @transform_6(%arg0: i32, %arg1: i32, %arg2: i32) -> (i32, i32, i32, i32) {
    %c0_i32 = arith.constant 0 : i32
    %c0_i32_0 = arith.constant 0 : i32
    return %arg0, %arg2, %arg1, %c0_i32 : i32, i32, i32, i32
  }
  func.func @transform_7(%arg0: i32, %arg1: i32, %arg2: i32) -> (i32, i32, i32, i32) {
    %c0_i32 = arith.constant 0 : i32
    %c0_i32_0 = arith.constant 0 : i32
    return %arg0, %arg2, %arg1, %c0_i32 : i32, i32, i32, i32
  }
  func.func @transform_8(%arg0: i32, %arg1: i32, %arg2: i32) -> (i32, i32, i32, i32) {
    %c0_i32 = arith.constant 0 : i32
    %c0_i32_0 = arith.constant 0 : i32
    return %arg0, %arg2, %arg1, %c0_i32 : i32, i32, i32, i32
  }
}

</mosaic_0001>

<bundles_post_ra>
// kernel: tpu_custom_call.1
= control target key start
LH: loop header
LB: loop body
LE: loop exit
PB: predicated region body
PF: predicated region fallthrough
CT: control target
= control target key end

     0   :  { %s1444_s0 = inlined_call_operand.vmem [shape: bf16[2,8,32], index: 0, kind: input, shape index: {}]   ;;  %s1445_s1 = inlined_call_operand.vmem [shape: bf16[4,32,8], index: 1, kind: input, shape index: {}]   ;;  %s1446_s2 = inlined_call_operand.vmem [shape: bf16[4,32,8], index: 2, kind: input, shape index: {}]   ;;  %s1447_s3 = inlined_call_operand.vmem [shape: bf16[4,32,8], index: 3, kind: input, shape index: {}]   ;;  %s1448_s4 = inlined_call_operand.vmem [shape: f32[8,4], index: 4, kind: input, shape index: {}]   ;;  %s1449_s5 = inlined_call_operand.vmem [shape: f32[8,4], index: 5, kind: input, shape index: {}]   ;;  %s1450_s6 = inlined_call_operand.hbm [shape: bf16[2,4,8,8], index: 6, kind: output, shape index: {0}]   ;;  %s1451_s7 = inlined_call_operand.hbm [shape: bf16[2,4,8,8], index: 7, kind: output, shape index: {1}]   ;;  %s1452_s8 = inlined_call_operand.hbm [shape: bf16[2,4,8,8], index: 8, kind: output, shape index: {2}]  }
   0x1   :  { %1460 = sst [smem:[#allocation15_spill]] %s1449_s5 }
   0x2   :  { %14 = vsyncpa [#allocation3], 0 }
   0x3   :  { %16 = vsyncpa [#allocation3 + $0x1], 0 }
   0x4   :  { %17 = vsyncpa [#allocation5], 0 }
   0x5   :  { %19 = vsyncpa [#allocation5 + $0x1], 0  ;;  %s1224_s27 = smov 0   ;;  %s1226_s28 = smov 0  }
   0x6   :  { %s1228_s29 = smov 0   ;;  %s1230_s30 = smov 0  }
   0x7   :  { %s1232_s9 = smov 0   ;;  %s1234_s10 = smov 0  }
   0x8   :  { %s1236_s11 = smov 0   ;;  %s1238_s12 = smov 0  }
   0x9 LB: > { %1461 = sst [smem:[#allocation9_spill]] %s1155_s29  ;;  %s1454_s13 = sadd.s32 4294967295, %s1175_s12   ;;  %s1175_s12 = sphi %s1238_s12, %s25_s12   ;;  %s1171_s11 = sphi %s1236_s11, %s1477_s11   ;;  %s1167_s10 = sphi %s1234_s10, %s1476_s10   ;;  %s1163_s9 = sphi %s1232_s9, %s1475_s9   ;;  %s1159_s30 = sphi %s1230_s30, %s1474_s30   ;;  %s1155_s29 = sphi %s1228_s29, %s1473_s29   ;;  %s1151_s28 = sphi %s1226_s28, %s1479_s28   ;;  %s1147_s27 = sphi %s1224_s27, %s1478_s27  }
   0xa   : > { %1462 = sst [smem:[#allocation10_spill]] %s1167_s10  ;;  %s1453_s14 = sadd.s32 4294967294, %s1175_s12  }
   0xb   : > { %1463 = sst [smem:[#allocation11_spill]] %s1171_s11  ;;  %s37_s15 = sadd.s32 1, %s1167_s10 }
   0xc   : > { %p38_p0 = scmp.ge.s32.totalorder %s37_s15, 4  ;;  %s44_s16 = sadd.s32 1, %s1171_s11 }
   0xd   : > { %p223_p1 = scmp.ne.s32.totalorder %s1155_s29, %s1151_s28  ;;  %p224_p2 = scmp.eq.s32.totalorder %s1454_s13, 7 }
   0xe   : > { %s1481_s15 = smov (%p38_p0, %s37_s15), 0  ;;  %s1483_s16 = smov (!%p38_p0, %s44_s16), %s1171_s11 }
   0xf   : > { %1464 = sst [smem:[#allocation12_spill]] %s1481_s15  ;;  %s207_s17 = ssub.s32 %s1167_s10, %s1481_s15 }
  0x10   : > { %p1277_p3 = por %p224_p2, %p223_p1  ;;  %p46_p4 = scmp.ge.s32.totalorder %s1483_s16, 2 }
  0x11   : > { %p229_p5 = scmp.ne.s32.totalorder %s1151_s28, %s1147_s27  ;;  %p230_p6 = scmp.eq.s32.totalorder %s1453_s14, 7 }
  0x12   : > { %p880_p7 = scmp.ge.s32.totalorder %s1175_s12, 1  ;;  %s1485_s16 = smov (%p46_p4, %s1483_s16), 0 }
  0x13   : > { %1466 = sst [smem:[#allocation13_spill]] %s1485_s16  ;;  %p1288_p8 = por %p230_p6, %p229_p5 }
  0x14   : > { %p356_p9 = scmp.lt.s32.totalorder %s1175_s12, 9  ;;  %s206_s20 = ssub.s32 %s1171_s11, %s1485_s16 }
  0x15   : > { %s213_s21 = sadd.s32 1, %s1155_s29  ;;  %s208_s22 = sor.u32 %s207_s17, %s206_s20 }
  0x16   : > { %p357_p10 = pnand %p880_p7, %p356_p9  ;;  %p211_p11 = scmp.eq.s32.totalorder %s208_s22, 0 }
  0x17   : > { %p432_p12 = scmp.lt.s32.totalorder (!%p357_p10), %s1159_s30, 3  ;;  %p425_p13 = scmp.lt.s32.totalorder (!%p357_p10), %s1163_s9, 1 }
  0x18   : > { %s1297_s23 = scalar_select %p211_p11, %s1155_s29, %s213_s21  }
  0x19   : > { %360 = sbr.rel (%p357_p10) target bundleno = 308 (0x134), region = 44  ;;  %s1469_s5 = sld [smem:[#allocation15_spill]] (!%p357_p10) }
  0x1a   : > { %1468 = sst [smem:[#allocation14_spill]] %s1297_s23  ;;  %s1177_s14 = smov (!%p357_p10), 4  }
  0x1b   : > { %s408_s29 = sand.u32 (!%p357_p10), 1, %s1151_s28   ;;  %s1041_s21 = scalar_lea.hbm (!%p357_p10), %s1451_s7, 32 }
  0x1e   : > { %s433_s26 = scalar_select %p432_p12, %s1159_s30, 3  ;;  %v1319_v3 = vld [vmem:[%s1448_s4] sm:$0xff]  ;;  %vm473_vm0 = vcmask 261120   ;;  %vm591_vm1 = vcmask 60416   ;;  %vm572_vm2 = vcmask 31744  }
  0x1f   : > { %v549_v0 = vld [vmem:[%s1469_s5] sm:$0xff]  ;;  %s426_s17 = scalar_select %p425_p13, %s1163_s9, 1 }
  0x20   : > { %552 = vrot.lane.b32.xlu0 %v549_v0, %s1177_s14  ;;  %s929_s20 = sshll.u32 %s433_s26, 4  ;;  %s1178_s5 = smov 124  }
  0x21   : > { %s436_s13 = scalar_lea.vmem %s1445_s1, %s929_s20  ;;  %s441_s11 = scalar_lea.vmem %s1446_s2, %s929_s20 }
  0x22   : > { %v933_v1 = vld [vmem:[%s436_s13 + $0x8] sm:$0xff]  ;;  %s884_s10 = sshll.u32 %s426_s17, 2  ;;  %s446_s25 = scalar_lea.vmem %s1447_s3, %s929_s20  ;;  %v932_v5 = vld [vmem:[%s436_s13] sm:$0xff] }
  0x23   : > { %v935_v2 = vld [vmem:[%s441_s11 + $0x8] sm:$0xff]  ;;  %483 = vmatpush.bf16.msra.mxu0 %v933_v1  ;;  %v934_v6 = vld [vmem:[%s441_s11] sm:$0xff]  ;;  %s431_s16 = scalar_lea.vmem %s1444_s0, %s884_s10  ;;  %s1335_s10 = sshll.u32 %s408_s29, 2 }
  0x24   : > { %v937_v4 = vld [vmem:[%s446_s25 + $0x8] sm:$0xff]  ;;  %512 = vmatpush.bf16.msra.mxu1 %v935_v2  ;;  %v936_v7 = vld [vmem:[%s446_s25] sm:$0xff]  ;;  %s424_s11 = scalar_lea.vmem [#allocation6], %s1335_s10  ;;  %s921_s13 = sshll.u32 %s1163_s9, 2 }
  0x25   : > { %541 = vmatpush.bf16.msra.mxu2 %v937_v4  ;;  %v456_v8 = vld [vmem:[%s431_s16] sm:$0xf]  ;;  %s619_s23 = sadd.s32 %s1159_s30, %s921_s13  ;;  %s1470_s30 = sadd.s32 4294967295, %s1175_s12  }
  0x26   : > { %s1341_s17 = sshll.u32 %s619_s23, 2  ;;  %s1354_s9 = sand.u32 1, %s1470_s30  }
  0x27   : > { %484 = vmatpush.bf16.msra.mxu0 %v932_v5  ;;  %s638_s22 = scalar_lea.hbm %s1451_s7, %s1341_s17  ;;  %s655_s25 = scalar_lea.hbm %s1452_s8, %s1341_s17 }
  0x28   : > { %562 = vrot.lane.b32.xlu0 %v1319_v3, %s1177_s14  ;;  %513 = vmatpush.bf16.msra.mxu1 %v934_v6  ;;  %s417_s26 = scalar_lea.vmem [#allocation4], %s1335_s10  ;;  %s642_s16 = sshll.u32 %s638_s22, 4  ;;  %s643_s16 = int_to_ptr.hbm [resolvable:$true] %s642_s16 }
  0x29   : > { %542 = vmatpush.bf16.msra.mxu2 %v936_v7  ;;  %s640_s15 = sshll.u32 %s417_s26, 4  ;;  %s1359_s13 = sshll.u32 %s655_s25, 4  ;;  %s641_s15 = int_to_ptr.vmem [resolvable:$true] %s640_s15  ;;  %s660_s13 = int_to_ptr.hbm [resolvable:$true] %s1359_s13 }
  0x2a   : > { %899 = vmatmul.msk.bf16.vlgmr.msra.gmra.mxu0 %vm473_vm0, %v456_v8  ;;  %s603_s23 = scalar_lea.sflag [#allocation5], %s1354_s9 }
  0x2b   : > { %908 = vmatmul.msk.bf16.vlgmr.msra.gmra.mxu1 %vm473_vm0, %v456_v8 }
  0x2c   : > { %917 = vmatmul.msk.bf16.vlgmr.msra.gmra.mxu2 %vm473_vm0, %v456_v8 }
  0x92   : > { %v553_v9 = vpop.permute.xlu0 %552 }
  0x9a   : > { %v563_v22 = vpop.permute.xlu0 %562 }
  0xa7   : > { %v1326_v10 = vpop.f32.mrf.mxu0 }
  0xa8   : > { %v515_v11 = vpop.f32.mrf.mxu1  ;;  %v555_v13 = vmul.f32 %v553_v9, %v1326_v10  ;;  %v566_v17 = vmul.f32 %v549_v0, %v1326_v10 }
  0xa9   : > { %v576_v12 = vmul.f32 %v553_v9, %v515_v11  ;;  %v583_v14 = vmul.f32 %v549_v0, %v515_v11  ;;  %v575_v23 = vmul.f32 %v1319_v3, %v515_v11  ;;  %v582_v24 = vmul.f32 %v563_v22, %v515_v11 }
  0xaa   : > { %557 = vrot.lane.b32.xlu1 %v555_v13, %s1178_s5 }
  0xab   : > { %578 = vrot.lane.b32.xlu2 %v576_v12, %s1178_s5  ;;  %s1357_s5 = sshll.u32 %s424_s11, 4  ;;  %s658_s5 = int_to_ptr.vmem [resolvable:$true] %s1357_s5 }
  0xaf   : > { %v488_v15 = vpop.f32.mrf.mxu0  ;;  %v544_v18 = vpop.f32.mrf.mxu2 }
  0xb0   : > { %v517_v16 = vpop.f32.mrf.mxu1  ;;  %v595_v19 = vpack.c.bf16 %v544_v18, %v544_v18 }
  0xb2   : > { %568 = vrot.lane.b32.xlu1 %v566_v17, %s1177_s14  ;;  %596 = vst.msk [vmem:[%s424_s11] sm:$0xf] %vm591_vm1, %v595_v19 }
  0xb3   : > { %585 = vrot.lane.b32.xlu2 %v583_v14, %s1177_s14  ;;  %s1035_s14 = sshra.s32 %s643_s16, 4  ;;  %s1036_s14 = int_to_ptr.hbm [resolvable:$true] %s1035_s14 }
  0xb4   : > { %s1037_s20 = scalar_lea.hbm %s1036_s14, 4  ;;  %p1042_p4 = scmp.lt.s32.totalorder %s1036_s14, %s1451_s7 }
  0xb5   : > { %p1038_p0 = scmp.ne.s32.totalorder %s1036_s14, %s1037_s20  ;;  %p1043_p5 = scmp.lt.s32.totalorder %s1041_s21, %s1037_s20 }
  0xb7   : > { %v546_v21 = vpop.f32.mrf.mxu2  ;;  %p1039_p1 = pnand %p1038_p0, %p1277_p3  ;;  %p1044_p6 = por %p1043_p5, %p1042_p4 }
  0xb9   : > { %p1040_p2 = pneg %p1039_p1 }
  0xbb   : > { %p1045_p7 = pnand %p1044_p6, %p1040_p2 }
 0x105   : > { %v579_v20 = vpop.permute.xlu2 %578 }
 0x106   : > { %v581_v26 = vsub.f32 %v575_v23, %v579_v20 }
 0x10d   : > { %v586_v25 = vpop.permute.xlu2 %585 }
 0x10e   : > { %v588_v27 = vadd.f32 %v586_v25, %v582_v24 }
 0x110   : > { %v589_v28 = vsel %vm572_vm2, %v581_v26, %v588_v27 }
 0x111   : > { %v593_v29 = vpack.c.bf16 %v589_v28, %v589_v28 }
 0x113   : > { %594 = vst.msk [vmem:[%s417_s26] sm:$0xf] %vm591_vm1, %v593_v29 }
 0x114   : > { %1048 = shalt.err (!%p1045_p7)
}
 0x115   : > { %939 = dma.vmem_to_hbm [thread:$0]  (%p1277_p3), %s641_s15, 64, %s643_s16, %s603_s23  }
 0x116   : > { %s1063_s30 = sshra.s32 %s660_s13, 4  ;;  %s1069_s14 = scalar_lea.hbm %s1452_s8, 32  ;;  %s1064_s30 = int_to_ptr.hbm [resolvable:$true] %s1063_s30 }
 0x117   : > { %s1065_s9 = scalar_lea.hbm %s1064_s30, 4  ;;  %p1070_p12 = scmp.lt.s32.totalorder %s1064_s30, %s1452_s8 }
 0x118   : > { %p1066_p9 = scmp.ne.s32.totalorder %s1064_s30, %s1065_s9  ;;  %p1071_p13 = scmp.lt.s32.totalorder %s1069_s14, %s1065_s9 }
 0x11a   : > { %p1067_p10 = pnand %p1066_p9, %p1277_p3  ;;  %p1072_p0 = por %p1071_p13, %p1070_p12 }
 0x11c   : > { %p1068_p11 = pneg %p1067_p10 }
 0x11e   : > { %p1073_p1 = pnand %p1072_p0, %p1068_p11 }
 0x120   : > { %1076 = shalt.err (!%p1073_p1)
}
 0x121   : > { %940 = dma.vmem_to_hbm [thread:$0]  (%p1277_p3), %s658_s5, 64, %s660_s13, %s603_s23   ;;  %v558_v30 = vpop.permute.xlu1 %557  ;;  %v550_v31 = vmul.f32 %v1319_v3, %v1326_v10  ;;  %v565_v32 = vmul.f32 %v563_v22, %v1326_v10 }
 0x122   : > { %s621_s21 = scalar_lea.hbm %s1450_s6, %s1341_s17  ;;  %s410_s24 = scalar_lea.vmem [#allocation2], %s1335_s10 }
 0x123   : > { %v560_v34 = vsub.f32 %v550_v31, %v558_v30  ;;  %s623_s25 = sshll.u32 %s410_s24, 4  ;;  %s625_s5 = sshll.u32 %s621_s21, 4  ;;  %s624_s25 = int_to_ptr.vmem [resolvable:$true] %s623_s25  ;;  %s626_s5 = int_to_ptr.hbm [resolvable:$true] %s625_s5 }
 0x124   : > { %s598_s13 = scalar_lea.sflag [#allocation3], %s408_s29  ;;  %s1091_s23 = sshra.s32 %s626_s5, 4  ;;  %s1092_s23 = int_to_ptr.hbm [resolvable:$true] %s1091_s23 }
 0x125   : > { %s1093_s30 = scalar_lea.hbm %s1092_s23, 4  ;;  %s1097_s10 = scalar_lea.hbm %s1450_s6, 32 }
 0x126   : > { %p1094_p2 = scmp.ne.s32.totalorder %s1092_s23, %s1093_s30  ;;  %p1098_p6 = scmp.lt.s32.totalorder %s1092_s23, %s1450_s6 }
 0x127   : > { %p1099_p7 = scmp.lt.s32.totalorder %s1097_s10, %s1093_s30 }
 0x128   : > { %p1095_p4 = pnand %p1094_p2, %p1277_p3 }
 0x129   : > { %v569_v33 = vpop.permute.xlu1 %568  ;;  %p1100_p9 = por %p1099_p7, %p1098_p6 }
 0x12a   : > { %v571_v35 = vadd.f32 %v569_v33, %v565_v32  ;;  %p1096_p5 = pneg %p1095_p4 }
 0x12c   : > { %v573_v36 = vsel %vm572_vm2, %v560_v34, %v571_v35  ;;  %p1101_p10 = pnand %p1100_p9, %p1096_p5 }
 0x12d   : > { %v574_v37 = vmul.f32 0.35355338, %v573_v36 }
 0x12f   : > { %v590_v38 = vpack.c.bf16 %v574_v37, %v574_v37 }
 0x131   : > { %592 = vst.msk [vmem:[%s410_s24] sm:$0xf] %vm591_vm1, %v590_v38 }
 0x132   : > { %1104 = shalt.err (!%p1101_p10)
}
 0x133   : > { %938 = dma.vmem_to_hbm [thread:$0]  (%p1277_p3), %s624_s25, 64, %s626_s5, %s598_s13  }
 0x134 PF: > { %p954_p11 = scmp.ge.s32.totalorder %s1175_s12, 2  ;;  %s671_s29 = sand.u32 1, %s1147_s27  }
 0x135   : > { %s672_s14 = scalar_lea.sflag [#allocation3], %s671_s29 }
 0x136   : > { %p945_p12 = pnand %p954_p11, %p1288_p8 }
 0x138   : > { %p946_p13 = pneg %p945_p12 }
 0x13a   : > { %1138 = dma.done.wait (%p946_p13), %s672_s14, 64  }
 0x13b   : > { %1140 = vsyncadd (%p946_p13), %s672_s14, 4294967232  ;;  %s1471_s20 = sadd.s32 4294967294, %s1175_s12  }
 0x13c   : > { %s681_s22 = sand.u32 1, %s1471_s20  }
 0x13d   : > { %s682_s15 = scalar_lea.sflag [#allocation5], %s681_s22 }
 0x13e   : > { %1142 = dma.done.wait (%p946_p13), %s682_s15, 128  }
 0x13f   : > { %1144 = vsyncadd (%p946_p13), %s682_s15, 4294967168  ;;  %s25_s12 = sadd.s32 1, %s1175_s12   ;;  %s1472_s18 = sld [smem:[#allocation9_spill]] }
 0x140   : > { %p22_p3 = scmp.ge.s32.totalorder %s25_s12, 10   ;;  %s1473_s29 = sld [smem:[#allocation14_spill]] }
 0x141   : > { %s1474_s30 = sld [smem:[#allocation10_spill]]  ;;  %s1478_s27 = smov %s1151_s28 }
 0x142   : > { %s1475_s9 = sld [smem:[#allocation11_spill]]  ;;  %24 = sbr.rel (!%p22_p3) target bundleno = 9 (0x9), region = 126 }
 0x143   : > { %s1476_s10 = sld [smem:[#allocation12_spill]] }
 0x144   : > { %s1477_s11 = sld [smem:[#allocation13_spill]] }
 0x145   : > { %s1479_s28 = smov %s1472_s18 }
 0x147   :  { %698 = vsyncpa [#allocation3], 1 }
 0x148   :  { %700 = vsyncpa [#allocation3 + $0x1], 1 }
 0x149   :  { %701 = vsyncpa [#allocation5], 1 }
 0x14a   :  { %703 = vsyncpa [#allocation5 + $0x1], 1 }

</bundles_post_ra>
